<compile_context>
chip_gen: v6e
topology: v6e:2x2x1
jax: 0.10.0
libtpu: 0.0.40
codegen_flags: <defaults>
</compile_context>

<pallas_src>
import functools

import jax
import jax.numpy as jnp
from jax import lax
from jax.experimental import pallas as pl
from jax.experimental.pallas import tpu as pltpu


def topdown_kernel(x_ref, w1_ref, b1_ref, w2_ref, b2_ref, w3_ref, b3_ref,
                   o_ref, *, H, W, compute_dtype):
    HW = H * W
    x = x_ref[0]                                    # (Cin, HW), lane-dense

    # Column (w) coordinate of every output position along the lane axis.
    # Used to mask the left/right image borders for the dw = -1 / +1 taps.
    col = lax.broadcasted_iota(jnp.int32, (1, HW), 1) % W
    keep_left = (col >= 1).astype(jnp.float32)       # valid when dw == -1
    keep_right = (col <= W - 2).astype(jnp.float32)  # valid when dw == +1

    pad = W + 1   # covers the +/-(W+1) flat offsets of the nine 3x3 taps

    def conv3x3(xin, w_taps, b):
        # xin:    (C, HW) f32
        # w_taps: (9, Cout, C)   tap index t = (dh+1)*3 + (dw+1)
        # b:      (Cout, 1)
        C = xin.shape[0]
        cout = w_taps.shape[1]
        z = jnp.zeros((C, pad), jnp.float32)
        # Flat zero-padding of the spatial axis handles the top/bottom image
        # borders; only the row-wrap (left/right border) cases need masking.
        xp = jnp.concatenate([z, xin, z], axis=1)    # (C, HW + 2*pad)
        acc = jnp.zeros((cout, HW), jnp.float32)
        for dh in (-1, 0, 1):
            for dw in (-1, 0, 1):
                t = (dh + 1) * 3 + (dw + 1)
                s = pad + dh * W + dw                # static lane offset
                tap = xp[:, s:s + HW]                # (C, HW): lane shift only
                if dw == -1:
                    tap = tap * keep_left
                elif dw == 1:
                    tap = tap * keep_right
                acc += jnp.dot(w_taps[t].astype(compute_dtype),
                               tap.astype(compute_dtype),
                               preferred_element_type=jnp.float32)
        return acc + b

    # backbone: two 3x3 convs + ReLU, intermediate stays resident (no scratch)
    h1 = jnp.maximum(conv3x3(x, w1_ref[...], b1_ref[...]), 0.0)   # (Cmid, HW)
    h2 = jnp.maximum(conv3x3(h1, w2_ref[...], b2_ref[...]), 0.0)  # (Cmid, HW)

    # keypoint head: 1x1 conv == (K, Cmid) @ (Cmid, HW)
    out = jnp.dot(w3_ref[...].astype(compute_dtype),
                  h2.astype(compute_dtype),
                  preferred_element_type=jnp.float32) + b3_ref[...]
    o_ref[0] = out.astype(o_ref.dtype)              # (K, 256): lane-dense store


def topdown_forward(x_nchw, params, *, compute_dtype=jnp.float32):
    """params = (w1 (3,3,Cin,Cmid), b1 (Cmid,), w2 (3,3,Cmid,Cmid), b2 (Cmid,),
                 w3 (Cmid,K), b3 (K,)); returns (N, K, H, W) heatmaps.

    compute_dtype=jnp.bfloat16 halves matmul-operand traffic on v6e/v7x while
    keeping f32 accumulation (and f32 bias/ReLU, which suits v5e's VPU)."""
    w1, b1, w2, b2, w3, b3 = params
    N, Cin, H, W = x_nchw.shape
    Cmid = w1.shape[-1]
    K = w3.shape[-1]
    HW = H * W

    # NCHW with flattened spatial IS the kernel layout: (N, C, H*W).
    # No transpose and no spatial jnp.pad in the wrapper.
    x_flat = x_nchw.reshape(N, Cin, HW).astype(jnp.float32)

    # HWIO (3,3,C,Cout) -> per-tap (9, Cout, C): each tap is the (Cout, C)
    # left operand of a lane-dense (C, HW) matmul.
    w1_t = jnp.transpose(w1.reshape(9, Cin, Cmid), (0, 2, 1))
    w2_t = jnp.transpose(w2.reshape(9, Cmid, Cmid), (0, 2, 1))
    w3_t = w3.T                                     # (K, Cmid)
    b1c = b1.reshape(Cmid, 1)
    b2c = b2.reshape(Cmid, 1)
    b3c = b3.reshape(K, 1)

    kern = functools.partial(topdown_kernel, H=H, W=W,
                             compute_dtype=compute_dtype)

    out_flat = pl.pallas_call(
        kern,
        out_shape=jax.ShapeDtypeStruct((N, K, HW), jnp.float32),
        grid_spec=pltpu.PrefetchScalarGridSpec(
            num_scalar_prefetch=0,
            # One image per step: N parallel steps keeps both v7x TensorCores
            # fed; per-step VMEM is tiny so no vmem_limit override is needed.
            grid=(N,),
            in_specs=[
                pl.BlockSpec((1, Cin, HW), lambda n: (n, 0, 0)),
                pl.BlockSpec((9, Cmid, Cin), lambda n: (0, 0, 0)),
                pl.BlockSpec((Cmid, 1), lambda n: (0, 0)),
                pl.BlockSpec((9, Cmid, Cmid), lambda n: (0, 0, 0)),
                pl.BlockSpec((Cmid, 1), lambda n: (0, 0)),
                pl.BlockSpec((K, Cmid), lambda n: (0, 0)),
                pl.BlockSpec((K, 1), lambda n: (0, 0)),
            ],
            out_specs=pl.BlockSpec((1, K, HW), lambda n: (n, 0, 0)),
        ),
        compiler_params=pltpu.CompilerParams(
            dimension_semantics=("parallel",)),
    )(x_flat, w1_t, b1c, w2_t, b2c, w3_t, b3c)

    # (N, K, H*W) is already NCHW up to a free reshape.
    return out_flat.reshape(N, K, H, W)


def ref_forward(x_nchw, params):
    """Pure-JAX reference (lax conv) for correctness checking."""
    w1, b1, w2, b2, w3, b3 = params
    x = jnp.transpose(x_nchw, (0, 2, 3, 1)).astype(jnp.float32)   # NHWC
    dn = ("NHWC", "HWIO", "NHWC")
    h1 = lax.conv_general_dilated(x, w1, (1, 1), "SAME", dimension_numbers=dn)
    h1 = jax.nn.relu(h1 + b1)
    h2 = lax.conv_general_dilated(h1, w2, (1, 1), "SAME", dimension_numbers=dn)
    h2 = jax.nn.relu(h2 + b2)
    out = jnp.einsum("nhwc,ck->nhwk", h2, w3) + b3
    return jnp.transpose(out, (0, 3, 1, 2))


if __name__ == "__main__":
    key = jax.random.PRNGKey(0)
    N, Cin, H, W = 2, 4, 16, 16
    Cmid, K = 8, 6

    ks = jax.random.split(key, 7)
    w1 = 0.1 * jax.random.normal(ks[0], (3, 3, Cin, Cmid), jnp.float32)
    b1 = 0.1 * jax.random.normal(ks[1], (Cmid,), jnp.float32)
    w2 = 0.1 * jax.random.normal(ks[2], (3, 3, Cmid, Cmid), jnp.float32)
    b2 = 0.1 * jax.random.normal(ks[3], (Cmid,), jnp.float32)
    w3 = 0.1 * jax.random.normal(ks[4], (Cmid, K), jnp.float32)
    b3 = 0.1 * jax.random.normal(ks[5], (K,), jnp.float32)
    x = jax.random.normal(ks[6], (N, Cin, H, W), jnp.float32)
    params = (w1, b1, w2, b2, w3, b3)

    ref = jax.block_until_ready(ref_forward(x, params))

    # f32 path (exact check against the f32 lax.conv reference).
    out = jax.block_until_ready(topdown_forward(x, params))
    assert out.shape == (N, K, H, W), out.shape
    assert jnp.allclose(out, ref, atol=1e-4, rtol=1e-4), \
        float(jnp.max(jnp.abs(out - ref)))

    # bf16 matmul-operand path (v6e/v7x recommendation), f32 accumulation.
    out_bf16 = jax.block_until_ready(
        topdown_forward(x, params, compute_dtype=jnp.bfloat16))
    assert jnp.allclose(out_bf16, ref, atol=1e-1, rtol=1e-1), \
        float(jnp.max(jnp.abs(out_bf16 - ref)))

    print("KERNEL_OK")
</pallas_src>

<mosaic_0001>
module attributes {stable_mosaic.version = 11 : i64} {
  func.func @topdown_kernel(%arg0: i32, %arg1: memref<1x4x256xf32, #tpu.memory_space<vmem>>, %arg2: memref<9x8x4xf32, #tpu.memory_space<vmem>>, %arg3: memref<8x1xf32, #tpu.memory_space<vmem>>, %arg4: memref<9x8x8xf32, #tpu.memory_space<vmem>>, %arg5: memref<8x1xf32, #tpu.memory_space<vmem>>, %arg6: memref<6x8xf32, #tpu.memory_space<vmem>>, %arg7: memref<6x1xf32, #tpu.memory_space<vmem>>, %arg8: memref<1x6x256xf32, #tpu.memory_space<vmem>>) attributes {dimension_semantics = [#tpu.dimension_semantics<parallel>], iteration_bounds = array<i64: 2>, scalar_prefetch = 0 : i64, scratch_operands = 0 : i64, tpu.core_type = #tpu.core_type<tc>, window_params = [{transform_indices = @transform_0, window_bounds = array<i64: 1, 4, 256>}, {pipeline_mode = #tpu.pipeline_mode<synchronous>, transform_indices = @transform_1, window_bounds = array<i64: 9, 8, 4>}, {pipeline_mode = #tpu.pipeline_mode<synchronous>, transform_indices = @transform_2, window_bounds = array<i64: 8, 1>}, {pipeline_mode = #tpu.pipeline_mode<synchronous>, transform_indices = @transform_3, window_bounds = array<i64: 9, 8, 8>}, {pipeline_mode = #tpu.pipeline_mode<synchronous>, transform_indices = @transform_4, window_bounds = array<i64: 8, 1>}, {pipeline_mode = #tpu.pipeline_mode<synchronous>, transform_indices = @transform_5, window_bounds = array<i64: 6, 8>}, {pipeline_mode = #tpu.pipeline_mode<synchronous>, transform_indices = @transform_6, window_bounds = array<i64: 6, 1>}, {transform_indices = @transform_7, window_bounds = array<i64: 1, 6, 256>}]} {
    %c0 = arith.constant 0 : index
    %c0_0 = arith.constant 0 : index
    %c0_1 = arith.constant 0 : index
    %0 = vector.load %arg1[%c0, %c0_0, %c0_1] : memref<1x4x256xf32, #tpu.memory_space<vmem>>, vector<1x4x256xf32>
    %1 = vector.shape_cast %0 : vector<1x4x256xf32> to vector<4x256xf32>
    %2 = tpu.iota {dimensions = array<i32: 1>} : vector<1x256xi32>
    %c16_i32 = arith.constant 16 : i32
    %c0_i32 = arith.constant 0 : i32
    %3 = arith.cmpi eq, %c16_i32, %c0_i32 : i32
    %c1_i32 = arith.constant 1 : i32
    %4 = arith.select %3, %c1_i32, %c16_i32 : i32
    %5 = vector.broadcast %4 : i32 to vector<1x256xi32>
    %6 = arith.remsi %2, %5 : vector<1x256xi32>
    %c0_i32_2 = arith.constant 0 : i32
    %7 = vector.broadcast %c0_i32_2 : i32 to vector<1x256xi32>
    %8 = arith.cmpi ne, %6, %7 : vector<1x256xi32>
    %c0_i32_3 = arith.constant 0 : i32
    %9 = vector.broadcast %c0_i32_3 : i32 to vector<1x256xi32>
    %10 = arith.cmpi slt, %6, %9 : vector<1x256xi32>
    %c0_i32_4 = arith.constant 0 : i32
    %11 = arith.cmpi slt, %4, %c0_i32_4 : i32
    %12 = vector.broadcast %11 : i1 to vector<1x256xi1>
    %13 = vector.broadcast %12 : vector<1x256xi1> to vector<1x256xi1>
    %14 = arith.xori %10, %13 : vector<1x256xi1>
    %15 = arith.andi %14, %8 : vector<1x256xi1>
    %16 = vector.broadcast %4 : i32 to vector<1x256xi32>
    %17 = arith.addi %6, %16 : vector<1x256xi32>
    %18 = arith.select %15, %17, %6 : vector<1x256xi1>, vector<1x256xi32>
    %c1_i32_5 = arith.constant 1 : i32
    %19 = vector.broadcast %c1_i32_5 : i32 to vector<1x256xi32>
    %20 = arith.cmpi sge, %18, %19 : vector<1x256xi32>
    %21 = arith.extui %20 : vector<1x256xi1> to vector<1x256xi32>
    %22 = arith.sitofp %21 : vector<1x256xi32> to vector<1x256xf32>
    %c14_i32 = arith.constant 14 : i32
    %23 = vector.broadcast %c14_i32 : i32 to vector<1x256xi32>
    %24 = arith.cmpi sle, %18, %23 : vector<1x256xi32>
    %25 = arith.extui %24 : vector<1x256xi1> to vector<1x256xi32>
    %26 = arith.sitofp %25 : vector<1x256xi32> to vector<1x256xf32>
    %c0_6 = arith.constant 0 : index
    %c0_7 = arith.constant 0 : index
    %c0_8 = arith.constant 0 : index
    %27 = vector.load %arg2[%c0_6, %c0_7, %c0_8] : memref<9x8x4xf32, #tpu.memory_space<vmem>>, vector<9x8x4xf32>
    %c0_9 = arith.constant 0 : index
    %c0_10 = arith.constant 0 : index
    %28 = vector.load %arg3[%c0_9, %c0_10] : memref<8x1xf32, #tpu.memory_space<vmem>>, vector<8x1xf32>
    %cst = arith.constant 0.000000e+00 : f32
    %29 = vector.broadcast %cst : f32 to vector<4x17xf32>
    %30 = tpu.concatenate %29, %1, %29 in 1 : vector<4x17xf32>, vector<4x256xf32>, vector<4x17xf32> -> vector<4x290xf32>
    %cst_11 = arith.constant 0.000000e+00 : f32
    %31 = vector.broadcast %cst_11 : f32 to vector<8x256xf32>
    %32 = vector.extract_strided_slice %30 {offsets = [0, 0], sizes = [4, 256], strides = [1, 1]} : vector<4x290xf32> to vector<4x256xf32>
    %33 = vector.broadcast %22 : vector<1x256xf32> to vector<4x256xf32>
    %34 = arith.mulf %32, %33 : vector<4x256xf32>
    %35 = vector.extract_strided_slice %27 {offsets = [0, 0, 0], sizes = [1, 8, 4], strides = [1, 1, 1]} : vector<9x8x4xf32> to vector<1x8x4xf32>
    %36 = vector.shape_cast %35 : vector<1x8x4xf32> to vector<8x4xf32>
    %cst_12 = arith.constant dense<0.000000e+00> : vector<8x256xf32>
    %37 = tpu.matmul %36, %34, %cst_12 {dimension_numbers = #tpu.dot_dimension_numbers<[1], [0], [0], [1], [0, 0, 1, 1], [], []>} : vector<8x4xf32>, vector<4x256xf32>, vector<8x256xf32> -> vector<8x256xf32>
    %38 = arith.addf %31, %37 : vector<8x256xf32>
    %39 = vector.extract_strided_slice %30 {offsets = [0, 1], sizes = [4, 256], strides = [1, 1]} : vector<4x290xf32> to vector<4x256xf32>
    %40 = vector.extract_strided_slice %27 {offsets = [1, 0, 0], sizes = [1, 8, 4], strides = [1, 1, 1]} : vector<9x8x4xf32> to vector<1x8x4xf32>
    %41 = vector.shape_cast %40 : vector<1x8x4xf32> to vector<8x4xf32>
    %cst_13 = arith.constant dense<0.000000e+00> : vector<8x256xf32>
    %42 = tpu.matmul %41, %39, %cst_13 {dimension_numbers = #tpu.dot_dimension_numbers<[1], [0], [0], [1], [0, 0, 1, 1], [], []>} : vector<8x4xf32>, vector<4x256xf32>, vector<8x256xf32> -> vector<8x256xf32>
    %43 = arith.addf %38, %42 : vector<8x256xf32>
    %44 = vector.extract_strided_slice %30 {offsets = [0, 2], sizes = [4, 256], strides = [1, 1]} : vector<4x290xf32> to vector<4x256xf32>
    %45 = vector.broadcast %26 : vector<1x256xf32> to vector<4x256xf32>
    %46 = arith.mulf %44, %45 : vector<4x256xf32>
    %47 = vector.extract_strided_slice %27 {offsets = [2, 0, 0], sizes = [1, 8, 4], strides = [1, 1, 1]} : vector<9x8x4xf32> to vector<1x8x4xf32>
    %48 = vector.shape_cast %47 : vector<1x8x4xf32> to vector<8x4xf32>
    %cst_14 = arith.constant dense<0.000000e+00> : vector<8x256xf32>
    %49 = tpu.matmul %48, %46, %cst_14 {dimension_numbers = #tpu.dot_dimension_numbers<[1], [0], [0], [1], [0, 0, 1, 1], [], []>} : vector<8x4xf32>, vector<4x256xf32>, vector<8x256xf32> -> vector<8x256xf32>
    %50 = arith.addf %43, %49 : vector<8x256xf32>
    %51 = vector.extract_strided_slice %30 {offsets = [0, 16], sizes = [4, 256], strides = [1, 1]} : vector<4x290xf32> to vector<4x256xf32>
    %52 = vector.broadcast %22 : vector<1x256xf32> to vector<4x256xf32>
    %53 = arith.mulf %51, %52 : vector<4x256xf32>
    %54 = vector.extract_strided_slice %27 {offsets = [3, 0, 0], sizes = [1, 8, 4], strides = [1, 1, 1]} : vector<9x8x4xf32> to vector<1x8x4xf32>
    %55 = vector.shape_cast %54 : vector<1x8x4xf32> to vector<8x4xf32>
    %cst_15 = arith.constant dense<0.000000e+00> : vector<8x256xf32>
    %56 = tpu.matmul %55, %53, %cst_15 {dimension_numbers = #tpu.dot_dimension_numbers<[1], [0], [0], [1], [0, 0, 1, 1], [], []>} : vector<8x4xf32>, vector<4x256xf32>, vector<8x256xf32> -> vector<8x256xf32>
    %57 = arith.addf %50, %56 : vector<8x256xf32>
    %58 = vector.extract_strided_slice %30 {offsets = [0, 17], sizes = [4, 256], strides = [1, 1]} : vector<4x290xf32> to vector<4x256xf32>
    %59 = vector.extract_strided_slice %27 {offsets = [4, 0, 0], sizes = [1, 8, 4], strides = [1, 1, 1]} : vector<9x8x4xf32> to vector<1x8x4xf32>
    %60 = vector.shape_cast %59 : vector<1x8x4xf32> to vector<8x4xf32>
    %cst_16 = arith.constant dense<0.000000e+00> : vector<8x256xf32>
    %61 = tpu.matmul %60, %58, %cst_16 {dimension_numbers = #tpu.dot_dimension_numbers<[1], [0], [0], [1], [0, 0, 1, 1], [], []>} : vector<8x4xf32>, vector<4x256xf32>, vector<8x256xf32> -> vector<8x256xf32>
    %62 = arith.addf %57, %61 : vector<8x256xf32>
    %63 = vector.extract_strided_slice %30 {offsets = [0, 18], sizes = [4, 256], strides = [1, 1]} : vector<4x290xf32> to vector<4x256xf32>
    %64 = vector.broadcast %26 : vector<1x256xf32> to vector<4x256xf32>
    %65 = arith.mulf %63, %64 : vector<4x256xf32>
    %66 = vector.extract_strided_slice %27 {offsets = [5, 0, 0], sizes = [1, 8, 4], strides = [1, 1, 1]} : vector<9x8x4xf32> to vector<1x8x4xf32>
    %67 = vector.shape_cast %66 : vector<1x8x4xf32> to vector<8x4xf32>
    %cst_17 = arith.constant dense<0.000000e+00> : vector<8x256xf32>
    %68 = tpu.matmul %67, %65, %cst_17 {dimension_numbers = #tpu.dot_dimension_numbers<[1], [0], [0], [1], [0, 0, 1, 1], [], []>} : vector<8x4xf32>, vector<4x256xf32>, vector<8x256xf32> -> vector<8x256xf32>
    %69 = arith.addf %62, %68 : vector<8x256xf32>
    %70 = vector.extract_strided_slice %30 {offsets = [0, 32], sizes = [4, 256], strides = [1, 1]} : vector<4x290xf32> to vector<4x256xf32>
    %71 = vector.broadcast %22 : vector<1x256xf32> to vector<4x256xf32>
    %72 = arith.mulf %70, %71 : vector<4x256xf32>
    %73 = vector.extract_strided_slice %27 {offsets = [6, 0, 0], sizes = [1, 8, 4], strides = [1, 1, 1]} : vector<9x8x4xf32> to vector<1x8x4xf32>
    %74 = vector.shape_cast %73 : vector<1x8x4xf32> to vector<8x4xf32>
    %cst_18 = arith.constant dense<0.000000e+00> : vector<8x256xf32>
    %75 = tpu.matmul %74, %72, %cst_18 {dimension_numbers = #tpu.dot_dimension_numbers<[1], [0], [0], [1], [0, 0, 1, 1], [], []>} : vector<8x4xf32>, vector<4x256xf32>, vector<8x256xf32> -> vector<8x256xf32>
    %76 = arith.addf %69, %75 : vector<8x256xf32>
    %77 = vector.extract_strided_slice %30 {offsets = [0, 33], sizes = [4, 256], strides = [1, 1]} : vector<4x290xf32> to vector<4x256xf32>
    %78 = vector.extract_strided_slice %27 {offsets = [7, 0, 0], sizes = [1, 8, 4], strides = [1, 1, 1]} : vector<9x8x4xf32> to vector<1x8x4xf32>
    %79 = vector.shape_cast %78 : vector<1x8x4xf32> to vector<8x4xf32>
    %cst_19 = arith.constant dense<0.000000e+00> : vector<8x256xf32>
    %80 = tpu.matmul %79, %77, %cst_19 {dimension_numbers = #tpu.dot_dimension_numbers<[1], [0], [0], [1], [0, 0, 1, 1], [], []>} : vector<8x4xf32>, vector<4x256xf32>, vector<8x256xf32> -> vector<8x256xf32>
    %81 = arith.addf %76, %80 : vector<8x256xf32>
    %82 = vector.extract_strided_slice %30 {offsets = [0, 34], sizes = [4, 256], strides = [1, 1]} : vector<4x290xf32> to vector<4x256xf32>
    %83 = vector.broadcast %26 : vector<1x256xf32> to vector<4x256xf32>
    %84 = arith.mulf %82, %83 : vector<4x256xf32>
    %85 = vector.extract_strided_slice %27 {offsets = [8, 0, 0], sizes = [1, 8, 4], strides = [1, 1, 1]} : vector<9x8x4xf32> to vector<1x8x4xf32>
    %86 = vector.shape_cast %85 : vector<1x8x4xf32> to vector<8x4xf32>
    %cst_20 = arith.constant dense<0.000000e+00> : vector<8x256xf32>
    %87 = tpu.matmul %86, %84, %cst_20 {dimension_numbers = #tpu.dot_dimension_numbers<[1], [0], [0], [1], [0, 0, 1, 1], [], []>} : vector<8x4xf32>, vector<4x256xf32>, vector<8x256xf32> -> vector<8x256xf32>
    %88 = arith.addf %81, %87 : vector<8x256xf32>
    %89 = vector.broadcast %28 : vector<8x1xf32> to vector<8x256xf32>
    %90 = arith.addf %88, %89 : vector<8x256xf32>
    %cst_21 = arith.constant 0.000000e+00 : f32
    %91 = vector.broadcast %cst_21 : f32 to vector<8x256xf32>
    %92 = arith.maximumf %90, %91 : vector<8x256xf32>
    %c0_22 = arith.constant 0 : index
    %c0_23 = arith.constant 0 : index
    %c0_24 = arith.constant 0 : index
    %93 = vector.load %arg4[%c0_22, %c0_23, %c0_24] : memref<9x8x8xf32, #tpu.memory_space<vmem>>, vector<9x8x8xf32>
    %c0_25 = arith.constant 0 : index
    %c0_26 = arith.constant 0 : index
    %94 = vector.load %arg5[%c0_25, %c0_26] : memref<8x1xf32, #tpu.memory_space<vmem>>, vector<8x1xf32>
    %cst_27 = arith.constant 0.000000e+00 : f32
    %95 = vector.broadcast %cst_27 : f32 to vector<8x17xf32>
    %96 = tpu.concatenate %95, %92, %95 in 1 : vector<8x17xf32>, vector<8x256xf32>, vector<8x17xf32> -> vector<8x290xf32>
    %cst_28 = arith.constant 0.000000e+00 : f32
    %97 = vector.broadcast %cst_28 : f32 to vector<8x256xf32>
    %98 = vector.extract_strided_slice %96 {offsets = [0, 0], sizes = [8, 256], strides = [1, 1]} : vector<8x290xf32> to vector<8x256xf32>
    %99 = vector.broadcast %22 : vector<1x256xf32> to vector<8x256xf32>
    %100 = arith.mulf %98, %99 : vector<8x256xf32>
    %101 = vector.extract_strided_slice %93 {offsets = [0, 0, 0], sizes = [1, 8, 8], strides = [1, 1, 1]} : vector<9x8x8xf32> to vector<1x8x8xf32>
    %102 = vector.shape_cast %101 : vector<1x8x8xf32> to vector<8x8xf32>
    %cst_29 = arith.constant dense<0.000000e+00> : vector<8x256xf32>
    %103 = tpu.matmul %102, %100, %cst_29 {dimension_numbers = #tpu.dot_dimension_numbers<[1], [0], [0], [1], [0, 0, 1, 1], [], []>} : vector<8x8xf32>, vector<8x256xf32>, vector<8x256xf32> -> vector<8x256xf32>
    %104 = arith.addf %97, %103 : vector<8x256xf32>
    %105 = vector.extract_strided_slice %96 {offsets = [0, 1], sizes = [8, 256], strides = [1, 1]} : vector<8x290xf32> to vector<8x256xf32>
    %106 = vector.extract_strided_slice %93 {offsets = [1, 0, 0], sizes = [1, 8, 8], strides = [1, 1, 1]} : vector<9x8x8xf32> to vector<1x8x8xf32>
    %107 = vector.shape_cast %106 : vector<1x8x8xf32> to vector<8x8xf32>
    %cst_30 = arith.constant dense<0.000000e+00> : vector<8x256xf32>
    %108 = tpu.matmul %107, %105, %cst_30 {dimension_numbers = #tpu.dot_dimension_numbers<[1], [0], [0], [1], [0, 0, 1, 1], [], []>} : vector<8x8xf32>, vector<8x256xf32>, vector<8x256xf32> -> vector<8x256xf32>
    %109 = arith.addf %104, %108 : vector<8x256xf32>
    %110 = vector.extract_strided_slice %96 {offsets = [0, 2], sizes = [8, 256], strides = [1, 1]} : vector<8x290xf32> to vector<8x256xf32>
    %111 = vector.broadcast %26 : vector<1x256xf32> to vector<8x256xf32>
    %112 = arith.mulf %110, %111 : vector<8x256xf32>
    %113 = vector.extract_strided_slice %93 {offsets = [2, 0, 0], sizes = [1, 8, 8], strides = [1, 1, 1]} : vector<9x8x8xf32> to vector<1x8x8xf32>
    %114 = vector.shape_cast %113 : vector<1x8x8xf32> to vector<8x8xf32>
    %cst_31 = arith.constant dense<0.000000e+00> : vector<8x256xf32>
    %115 = tpu.matmul %114, %112, %cst_31 {dimension_numbers = #tpu.dot_dimension_numbers<[1], [0], [0], [1], [0, 0, 1, 1], [], []>} : vector<8x8xf32>, vector<8x256xf32>, vector<8x256xf32> -> vector<8x256xf32>
    %116 = arith.addf %109, %115 : vector<8x256xf32>
    %117 = vector.extract_strided_slice %96 {offsets = [0, 16], sizes = [8, 256], strides = [1, 1]} : vector<8x290xf32> to vector<8x256xf32>
    %118 = vector.broadcast %22 : vector<1x256xf32> to vector<8x256xf32>
    %119 = arith.mulf %117, %118 : vector<8x256xf32>
    %120 = vector.extract_strided_slice %93 {offsets = [3, 0, 0], sizes = [1, 8, 8], strides = [1, 1, 1]} : vector<9x8x8xf32> to vector<1x8x8xf32>
    %121 = vector.shape_cast %120 : vector<1x8x8xf32> to vector<8x8xf32>
    %cst_32 = arith.constant dense<0.000000e+00> : vector<8x256xf32>
    %122 = tpu.matmul %121, %119, %cst_32 {dimension_numbers = #tpu.dot_dimension_numbers<[1], [0], [0], [1], [0, 0, 1, 1], [], []>} : vector<8x8xf32>, vector<8x256xf32>, vector<8x256xf32> -> vector<8x256xf32>
    %123 = arith.addf %116, %122 : vector<8x256xf32>
    %124 = vector.extract_strided_slice %96 {offsets = [0, 17], sizes = [8, 256], strides = [1, 1]} : vector<8x290xf32> to vector<8x256xf32>
    %125 = vector.extract_strided_slice %93 {offsets = [4, 0, 0], sizes = [1, 8, 8], strides = [1, 1, 1]} : vector<9x8x8xf32> to vector<1x8x8xf32>
    %126 = vector.shape_cast %125 : vector<1x8x8xf32> to vector<8x8xf32>
    %cst_33 = arith.constant dense<0.000000e+00> : vector<8x256xf32>
    %127 = tpu.matmul %126, %124, %cst_33 {dimension_numbers = #tpu.dot_dimension_numbers<[1], [0], [0], [1], [0, 0, 1, 1], [], []>} : vector<8x8xf32>, vector<8x256xf32>, vector<8x256xf32> -> vector<8x256xf32>
    %128 = arith.addf %123, %127 : vector<8x256xf32>
    %129 = vector.extract_strided_slice %96 {offsets = [0, 18], sizes = [8, 256], strides = [1, 1]} : vector<8x290xf32> to vector<8x256xf32>
    %130 = vector.broadcast %26 : vector<1x256xf32> to vector<8x256xf32>
    %131 = arith.mulf %129, %130 : vector<8x256xf32>
    %132 = vector.extract_strided_slice %93 {offsets = [5, 0, 0], sizes = [1, 8, 8], strides = [1, 1, 1]} : vector<9x8x8xf32> to vector<1x8x8xf32>
    %133 = vector.shape_cast %132 : vector<1x8x8xf32> to vector<8x8xf32>
    %cst_34 = arith.constant dense<0.000000e+00> : vector<8x256xf32>
    %134 = tpu.matmul %133, %131, %cst_34 {dimension_numbers = #tpu.dot_dimension_numbers<[1], [0], [0], [1], [0, 0, 1, 1], [], []>} : vector<8x8xf32>, vector<8x256xf32>, vector<8x256xf32> -> vector<8x256xf32>
    %135 = arith.addf %128, %134 : vector<8x256xf32>
    %136 = vector.extract_strided_slice %96 {offsets = [0, 32], sizes = [8, 256], strides = [1, 1]} : vector<8x290xf32> to vector<8x256xf32>
    %137 = vector.broadcast %22 : vector<1x256xf32> to vector<8x256xf32>
    %138 = arith.mulf %136, %137 : vector<8x256xf32>
    %139 = vector.extract_strided_slice %93 {offsets = [6, 0, 0], sizes = [1, 8, 8], strides = [1, 1, 1]} : vector<9x8x8xf32> to vector<1x8x8xf32>
    %140 = vector.shape_cast %139 : vector<1x8x8xf32> to vector<8x8xf32>
    %cst_35 = arith.constant dense<0.000000e+00> : vector<8x256xf32>
    %141 = tpu.matmul %140, %138, %cst_35 {dimension_numbers = #tpu.dot_dimension_numbers<[1], [0], [0], [1], [0, 0, 1, 1], [], []>} : vector<8x8xf32>, vector<8x256xf32>, vector<8x256xf32> -> vector<8x256xf32>
    %142 = arith.addf %135, %141 : vector<8x256xf32>
    %143 = vector.extract_strided_slice %96 {offsets = [0, 33], sizes = [8, 256], strides = [1, 1]} : vector<8x290xf32> to vector<8x256xf32>
    %144 = vector.extract_strided_slice %93 {offsets = [7, 0, 0], sizes = [1, 8, 8], strides = [1, 1, 1]} : vector<9x8x8xf32> to vector<1x8x8xf32>
    %145 = vector.shape_cast %144 : vector<1x8x8xf32> to vector<8x8xf32>
    %cst_36 = arith.constant dense<0.000000e+00> : vector<8x256xf32>
    %146 = tpu.matmul %145, %143, %cst_36 {dimension_numbers = #tpu.dot_dimension_numbers<[1], [0], [0], [1], [0, 0, 1, 1], [], []>} : vector<8x8xf32>, vector<8x256xf32>, vector<8x256xf32> -> vector<8x256xf32>
    %147 = arith.addf %142, %146 : vector<8x256xf32>
    %148 = vector.extract_strided_slice %96 {offsets = [0, 34], sizes = [8, 256], strides = [1, 1]} : vector<8x290xf32> to vector<8x256xf32>
    %149 = vector.broadcast %26 : vector<1x256xf32> to vector<8x256xf32>
    %150 = arith.mulf %148, %149 : vector<8x256xf32>
    %151 = vector.extract_strided_slice %93 {offsets = [8, 0, 0], sizes = [1, 8, 8], strides = [1, 1, 1]} : vector<9x8x8xf32> to vector<1x8x8xf32>
    %152 = vector.shape_cast %151 : vector<1x8x8xf32> to vector<8x8xf32>
    %cst_37 = arith.constant dense<0.000000e+00> : vector<8x256xf32>
    %153 = tpu.matmul %152, %150, %cst_37 {dimension_numbers = #tpu.dot_dimension_numbers<[1], [0], [0], [1], [0, 0, 1, 1], [], []>} : vector<8x8xf32>, vector<8x256xf32>, vector<8x256xf32> -> vector<8x256xf32>
    %154 = arith.addf %147, %153 : vector<8x256xf32>
    %155 = vector.broadcast %94 : vector<8x1xf32> to vector<8x256xf32>
    %156 = arith.addf %154, %155 : vector<8x256xf32>
    %cst_38 = arith.constant 0.000000e+00 : f32
    %157 = vector.broadcast %cst_38 : f32 to vector<8x256xf32>
    %158 = arith.maximumf %156, %157 : vector<8x256xf32>
    %c0_39 = arith.constant 0 : index
    %c0_40 = arith.constant 0 : index
    %159 = vector.load %arg6[%c0_39, %c0_40] : memref<6x8xf32, #tpu.memory_space<vmem>>, vector<6x8xf32>
    %cst_41 = arith.constant dense<0.000000e+00> : vector<6x256xf32>
    %160 = tpu.matmul %159, %158, %cst_41 {dimension_numbers = #tpu.dot_dimension_numbers<[1], [0], [0], [1], [0, 0, 1, 1], [], []>} : vector<6x8xf32>, vector<8x256xf32>, vector<6x256xf32> -> vector<6x256xf32>
    %c0_42 = arith.constant 0 : index
    %c0_43 = arith.constant 0 : index
    %161 = vector.load %arg7[%c0_42, %c0_43] : memref<6x1xf32, #tpu.memory_space<vmem>>, vector<6x1xf32>
    %162 = vector.broadcast %161 : vector<6x1xf32> to vector<6x256xf32>
    %163 = arith.addf %160, %162 : vector<6x256xf32>
    %c0_44 = arith.constant 0 : index
    %c0_45 = arith.constant 0 : index
    %c0_46 = arith.constant 0 : index
    %164 = vector.load %arg8[%c0_44, %c0_45, %c0_46] : memref<1x6x256xf32, #tpu.memory_space<vmem>>, vector<1x6x256xf32>
    %165 = vector.shape_cast %164 : vector<1x6x256xf32> to vector<6x256xf32>
    %166 = vector.shape_cast %163 : vector<6x256xf32> to vector<1x6x256xf32>
    tpu.vector_store %arg8[%c0_44, %c0_45, %c0_46], %166 {strides = array<i32>} : memref<1x6x256xf32, #tpu.memory_space<vmem>>, vector<1x6x256xf32>,
    return
  }
  func.func @transform_0(%arg0: i32) -> (i32, i32, i32) {
    %c0_i32 = arith.constant 0 : i32
    %c0_i32_0 = arith.constant 0 : i32
    %c0_i32_1 = arith.constant 0 : i32
    return %arg0, %c0_i32, %c0_i32_0 : i32, i32, i32
  }
  func.func @transform_1(%arg0: i32) -> (i32, i32, i32) {
    %c0_i32 = arith.constant 0 : i32
    %c0_i32_0 = arith.constant 0 : i32
    %c0_i32_1 = arith.constant 0 : i32
    %c0_i32_2 = arith.constant 0 : i32
    return %c0_i32, %c0_i32_0, %c0_i32_1 : i32, i32, i32
  }
  func.func @transform_2(%arg0: i32) -> (i32, i32) {
    %c0_i32 = arith.constant 0 : i32
    %c0_i32_0 = arith.constant 0 : i32
    %c0_i32_1 = arith.constant 0 : i32
    return %c0_i32, %c0_i32_0 : i32, i32
  }
  func.func @transform_3(%arg0: i32) -> (i32, i32, i32) {
    %c0_i32 = arith.constant 0 : i32
    %c0_i32_0 = arith.constant 0 : i32
    %c0_i32_1 = arith.constant 0 : i32
    %c0_i32_2 = arith.constant 0 : i32
    return %c0_i32, %c0_i32_0, %c0_i32_1 : i32, i32, i32
  }
  func.func @transform_4(%arg0: i32) -> (i32, i32) {
    %c0_i32 = arith.constant 0 : i32
    %c0_i32_0 = arith.constant 0 : i32
    %c0_i32_1 = arith.constant 0 : i32
    return %c0_i32, %c0_i32_0 : i32, i32
  }
  func.func @transform_5(%arg0: i32) -> (i32, i32) {
    %c0_i32 = arith.constant 0 : i32
    %c0_i32_0 = arith.constant 0 : i32
    %c0_i32_1 = arith.constant 0 : i32
    return %c0_i32, %c0_i32_0 : i32, i32
  }
  func.func @transform_6(%arg0: i32) -> (i32, i32) {
    %c0_i32 = arith.constant 0 : i32
    %c0_i32_0 = arith.constant 0 : i32
    %c0_i32_1 = arith.constant 0 : i32
    return %c0_i32, %c0_i32_0 : i32, i32
  }
  func.func @transform_7(%arg0: i32) -> (i32, i32, i32) {
    %c0_i32 = arith.constant 0 : i32
    %c0_i32_0 = arith.constant 0 : i32
    %c0_i32_1 = arith.constant 0 : i32
    return %arg0, %c0_i32, %c0_i32_0 : i32, i32, i32
  }
}

</mosaic_0001>

<bundles_post_ra>
// kernel: tpu_custom_call.1
= control target key start
LH: loop header
LB: loop body
LE: loop exit
PB: predicated region body
PF: predicated region fallthrough
CT: control target
= control target key end

     0   :  { %s2360_s24 = smov 0   ;;  %s2709_s0 = inlined_call_operand.vmem [shape: f32[2,4,256], index: 0, kind: input, shape index: {}]   ;;  %s2710_s1 = inlined_call_operand.vmem [shape: f32[9,8,4], index: 1, kind: input, shape index: {}]   ;;  %s2711_s2 = inlined_call_operand.vmem [shape: f32[8,1], index: 2, kind: input, shape index: {}]   ;;  %s2712_s3 = inlined_call_operand.vmem [shape: f32[9,8,8], index: 3, kind: input, shape index: {}]   ;;  %s2713_s4 = inlined_call_operand.vmem [shape: f32[8,1], index: 4, kind: input, shape index: {}]   ;;  %s2714_s5 = inlined_call_operand.vmem [shape: f32[6,8], index: 5, kind: input, shape index: {}]   ;;  %s2715_s6 = inlined_call_operand.vmem [shape: f32[6,1], index: 6, kind: input, shape index: {}]   ;;  %s2716_s7 = inlined_call_operand.vmem [shape: f32[2,6,256], index: 7, kind: output, shape index: {}]  }
   0x1 LB: > { %s2190_s25 = sadd.s32 4294967295, %s2302_s24   ;;  %p2194_p0 = scmp.ge.s32.totalorder %s2302_s24, 1  ;;  %s2302_s24 = sphi %s2360_s24, %s17_s24  }
   0x2   : > { %p237_p1 = scmp.lt.s32.totalorder %s2302_s24, 3 }
   0x4   : > { %p238_p2 = pnand %p2194_p0, %p237_p1 }
   0x5   : > { %p269_p3 = scmp.lt.s32.totalorder (!%p238_p2), %s2190_s25, 1  ;;  %s2305_s30 = smov (!%p238_p2), 17  }
   0x6   : > { %241 = sbr.rel (%p238_p2) target bundleno = 1178 (0x49a), region = 48  ;;  %s2306_s8 = smov (!%p238_p2), 2  }
   0x7   : > { %s2307_s9 = smov (!%p238_p2), 18   ;;  %s2308_s10 = smov (!%p238_p2), 16  }
   0x8   : > { %s2309_s11 = smov (!%p238_p2), 34   ;;  %s2310_s12 = smov (!%p238_p2), 32  }
   0x9   : > { %s2311_s13 = smov (!%p238_p2), 127   ;;  %s2312_s14 = smov (!%p238_p2), 111  }
   0xa   : > { %s2313_s15 = smov (!%p238_p2), 126   ;;  %s2314_s16 = smov (!%p238_p2), 112  }
   0xb   : > { %v280_v0 = vlaneseq  ;;  %v2304_v1 = vmov 0.0   ;;  %s2718_s25 = smov (!%p269_p3, %s2190_s25), 1  ;;  %vm335_vm4 = vcmask 138240   ;;  %vm359_vm5 = vcmask 1043456   ;;  %s2315_s17 = smov 96   ;;  %v319_v37 = vld [vmem:[%s2710_s1] sm:$0xff] }
   0xc   : > { %428 = vmatprep.mubr.f32.mxu0 %v2304_v1  ;;  %508 = vmatprep.mubr.f32.mxu1 %v2304_v1  ;;  %s2242_s26 = sshll.u32 %s2718_s25, 3  ;;  %s2316_s20 = smov 110   ;;  %vm521_vm6 = vcmask 15360   ;;  %vm355_vm7 = vcmask 31744   ;;  %vm924_vm8 = vcmask 261120   ;;  %vm627_vm9 = vcmask 130048  }
   0xd   : > { %v281_v2 = vand.u32 127, %v280_v0  ;;  %s273_s29 = scalar_lea.vmem %s2709_s0, %s2242_s26  ;;  %s2317_s21 = smov 95   ;;  %vm1117_vm10 = vcmask 277504   ;;  %vm820_vm11 = vcmask 146432   ;;  %v2318_v55 = vmov 0   ;;  %v328_v58 = vld [vmem:[%s2711_s2] sm:$0xff] }
   0xe   : > { %v279_v5 = vld [vmem:[%s273_s29] sm:$0xff]  ;;  %2293 = vset.pattern.permute.xlu1 %v2318_v55  ;;  %2294 = vset.pattern.permute.xlu0 %v2318_v55  ;;  %s2319_s22 = smov 94   ;;  %vm352_vm12 = vcmask 1039360   ;;  %vm538_vm13 = vcmask 1031168   ;;  %vm733_vm14 = vcmask 908288   ;;  %vm941_vm15 = vcmask 785408  }
   0xf   : > { %v282_v3 = vadd.s32 128, %v281_v2  ;;  %v287_v4 = vand.u32 15, %v281_v2  ;;  %331 = vrot.lane.b32.xlu0 %v279_v5, %s2305_s30  ;;  %v330_v7 = vcombine.high %v279_v5, %v279_v5  ;;  %v320_v2 = vld [vmem:[%s2710_s1 + $0x8] sm:$0xff]  ;;  %v326_v55 = vld [vmem:[%s2710_s1 + $0x38] sm:$0xff] }
  0x11   : > { %v294_v6 = vand.u32 15, %v282_v3  ;;  %vm307_vm0 = vcmp.ge.s32.totalorder %v287_v4, 1  ;;  %vm313_vm1 = vcmp.le.s32.totalorder %v287_v4, 14 }
  0x12   : > { %v2201_v8 = vsel %vm313_vm1, 1.0, %v2304_v1  ;;  %v2380_v10 = vsel %vm307_vm0, 1.0, %v2304_v1  ;;  %vm644_vm0 = vcmask 916480   ;;  %vm837_vm1 = vcmask 900096  }
  0x13   : > { %vm314_vm2 = vcmp.le.s32.totalorder %v294_v6, 14  ;;  %vm308_vm3 = vcmp.ge.s32.totalorder %v294_v6, 1  ;;  %333 = vrot.lane.b32.xlu0 %v330_v7, %s2305_s30 }
  0x14   : > { %v2202_v9 = vsel %vm314_vm2, 1.0, %v2304_v1  ;;  %v2383_v11 = vsel %vm308_vm3, 1.0, %v2304_v1  ;;  %vm1030_vm2 = vcmask 777216   ;;  %vm1134_vm3 = vcmask 769024  }
  0x15   : > { %v2268_v12 = vpack.i.bf16 %v2202_v9, %v2201_v8  ;;  %v2273_v13 = vpack.i.bf16 %v2383_v11, %v2380_v10 }
  0x17   : > { %2269 = vrot.lane.b32.xlu1 %v2268_v12, %s2306_s8  ;;  %2279 = vrot.lane.b32.xlu0 %v2268_v12, %s2307_s9 }
  0x1b   : > { %2274 = vrot.lane.b32.xlu1 %v2273_v13, %s2308_s10  ;;  %2289 = vrot.lane.b32.xlu0 %v2268_v12, %s2309_s11 }
  0x1f   : > { %2284 = vrot.lane.b32.xlu1 %v2273_v13, %s2310_s12 }
  0x81   : > { %v332_v14 = vpop.permute.xlu0 %331 }
  0x82   : > { %v2389_v15 = vsel %vm335_vm4, 0.0, %v332_v14 }
  0x83   : > { %346 = vrot.lane.b32.xlu1 %v2389_v15, %s2311_s13  ;;  %727 = vrot.lane.b32.xlu0 %v2389_v15, %s2312_s14  ;;  %v342_v20 = vmul.f32 %v2380_v10, %v2389_v15 }
  0x85   : > { %v334_v16 = vpop.permute.xlu0 %333 }
  0x86   : > { %v2396_v17 = vsel %vm335_vm4, %v332_v14, %v334_v16  ;;  %v2399_v18 = vsel %vm335_vm4, %v334_v16, 0.0 }
  0x87   : > { %350 = vrot.lane.b32.xlu0 %v2399_v18, %s2311_s13  ;;  %348 = vrot.lane.b32.xlu1 %v2396_v17, %s2311_s13  ;;  %v343_v22 = vmul.f32 %v2383_v11, %v2396_v17 }
  0x89   : > { %v2270_v19 = vpop.permute.xlu1 %2269  ;;  %2206 = vmatprep.subr.msk.mxu1 %vm359_vm5, %v343_v22  ;;  %v2280_v27 = vpop.permute.xlu0 %2279 }
  0x8a   : > { %v2403_v21 = vunpack.i.l.bf16 %v2270_v19  ;;  %2207 = vmatpush1.msk.msra.mxu1 %vm359_vm5, %v342_v20  ;;  %v2425_v30 = vunpack.i.l.bf16 %v2280_v27  ;;  %v2434_v33 = vunpack.i.h.bf16 %v2280_v27  ;;  %v2440_v36 = vunpack.i.h.bf16 %v2270_v19 }
  0x8b   : > { %2208 = vmatmul.mubr.msk.f32.vlgmr.msra.gmra.mxu1 %vm355_vm7, %v319_v37  ;;  %v322_v37 = vld [vmem:[%s2710_s1 + $0x18] sm:$0xff] }
  0x8c   : > { %v526_v23 = vmul.f32 %v2403_v21, %v2389_v15  ;;  %v825_v35 = vmul.f32 %v2425_v30, %v2389_v15  ;;  %v827_v38 = vmul.f32 %v2434_v33, %v2399_v18  ;;  %718 = vmatprep.mubr.f32.mxu1 %v2304_v1  ;;  %v2453_v39 = vsel %vm521_vm6, %v2403_v21, %v2440_v36 }
  0x8d   : > { %v2275_v24 = vpop.permute.xlu1 %2274  ;;  %v527_v41 = vmul.f32 %v2453_v39, %v2396_v17  ;;  %v528_v42 = vmul.f32 %v2440_v36, %v2399_v18  ;;  %v2290_v43 = vpop.permute.xlu0 %2289  ;;  %v2493_v52 = vsel %vm820_vm11, %v2425_v30, %v2434_v33 }
  0x8e   : > { %v2415_v25 = vunpack.i.l.bf16 %v2275_v24  ;;  %532 = vrot.lane.b32.xlu0 %v526_v23, %s2313_s15  ;;  %v2427_v31 = vunpack.i.h.bf16 %v2275_v24  ;;  %v2468_v45 = vunpack.i.h.bf16 %v2290_v43  ;;  %v2470_v46 = vunpack.i.l.bf16 %v2290_v43  ;;  %v323_v24 = vld [vmem:[%s2710_s1 + $0x20] sm:$0xff] }
  0x8f   : > { %v826_v54 = vmul.f32 %v2493_v52, %v2396_v17 }
  0x90   : > { %v632_v26 = vmul.f32 %v2415_v25, %v2389_v15  ;;  %v634_v34 = vmul.f32 %v2427_v31, %v2399_v18  ;;  %v2478_v48 = vsel %vm627_vm9, %v2415_v25, %v2427_v31  ;;  %v2489_v51 = vsel %vm1117_vm10, %v2470_v46, %v2468_v45 }
  0x91   : > { %v2285_v28 = vpop.permute.xlu1 %2284  ;;  %v633_v50 = vmul.f32 %v2478_v48, %v2396_v17  ;;  %v1123_v53 = vmul.f32 %v2489_v51, %v2396_v17  ;;  %v1122_v56 = vmul.f32 %v2470_v46, %v2389_v15  ;;  %v1124_v57 = vmul.f32 %v2468_v45, %v2399_v18 }
  0x92   : > { %v2420_v29 = vunpack.i.l.bf16 %v2285_v28  ;;  %729 = vrot.lane.b32.xlu0 %v2396_v17, %s2312_s14  ;;  %638 = vrot.lane.b32.xlu1 %v632_v26, %s2314_s16  ;;  %v2458_v40 = vunpack.i.h.bf16 %v2285_v28 }
  0x94   : > { %v929_v32 = vmul.f32 %v2420_v29, %v2389_v15  ;;  %v931_v44 = vmul.f32 %v2458_v40, %v2399_v18  ;;  %v2474_v47 = vsel %vm924_vm8, %v2420_v29, %v2458_v40 }
  0x95   : > { %v930_v49 = vmul.f32 %v2474_v47, %v2396_v17 }
  0x96   : > { %935 = vrot.lane.b32.xlu0 %v929_v32, %s2315_s17  ;;  %731 = vrot.lane.b32.xlu1 %v2399_v18, %s2312_s14 }
  0x9a   : > { %642 = vrot.lane.b32.xlu0 %v634_v34, %s2314_s16  ;;  %831 = vrot.lane.b32.xlu1 %v825_v35, %s2316_s20 }
  0x9e   : > { %835 = vrot.lane.b32.xlu0 %v827_v38, %s2316_s20  ;;  %1026 = vrot.lane.b32.xlu1 %v2396_v17, %s2317_s21  ;;  %v325_v38 = vld [vmem:[%s2710_s1 + $0x30] sm:$0xff] }
  0xa2   : > { %534 = vrot.lane.b32.xlu0 %v527_v41, %s2313_s15  ;;  %536 = vrot.lane.b32.xlu1 %v528_v42, %s2313_s15 }
  0xa6   : > { %1028 = vrot.lane.b32.xlu0 %v2399_v18, %s2317_s21  ;;  %939 = vrot.lane.b32.xlu1 %v931_v44, %s2315_s17  ;;  %v321_v18 = vld [vmem:[%s2710_s1 + $0x10] sm:$0xff] }
  0xaa   : > { %937 = vrot.lane.b32.xlu0 %v930_v49, %s2315_s17  ;;  %640 = vrot.lane.b32.xlu1 %v633_v50, %s2314_s16  ;;  %v324_v49 = vld [vmem:[%s2710_s1 + $0x28] sm:$0xff] }
  0xae   : > { %1130 = vrot.lane.b32.xlu0 %v1123_v53, %s2319_s22  ;;  %833 = vrot.lane.b32.xlu1 %v826_v54, %s2316_s20 }
  0xb2   : > { %1128 = vrot.lane.b32.xlu0 %v1122_v56, %s2319_s22  ;;  %1024 = vrot.lane.b32.xlu1 %v2389_v15, %s2317_s21 }
  0xb6   : > { %1132 = vrot.lane.b32.xlu1 %v1124_v57, %s2319_s22 }
  0xba   : > { %1219 = vperm.xlu1 %2293, %v328_v58  }
  0xf5   : > { %v347_v59 = vpop.permute.xlu1 %346  ;;  %v728_v60 = vpop.permute.xlu0 %727 }
  0xf9   : > { %v349_v61 = vpop.permute.xlu1 %348  ;;  %v351_v62 = vpop.permute.xlu0 %350 }
  0xfa   : > { %v354_v63 = vsel %vm352_vm12, %v349_v61, %v351_v62  ;;  %v353_v0 = vsel %vm352_vm12, %v347_v59, %v349_v61  ;;  %v327_v59 = vld [vmem:[%s2710_s1 + $0x40] sm:$0xff] }
  0xfb   : > { %2203 = vmatprep.subr.msk.mxu0 %vm359_vm5, %v354_v63 }
  0xfc   : > { %2204 = vmatpush1.msk.msra.mxu0 %vm359_vm5, %v353_v0 }
  0xfd   : > { %2205 = vmatmul.mubr.msk.f32.vlgmr.msra.gmra.mxu0 %vm355_vm7, %v320_v2 }
  0xfe   : > { %612 = vmatprep.mubr.f32.mxu0 %v2304_v1 }
 0x100   : > { %v533_v3 = vpop.permute.xlu0 %532 }
 0x104   : > { %v639_v4 = vpop.permute.xlu1 %638  ;;  %v730_v5 = vpop.permute.xlu0 %729 }
 0x105   : > { %v734_v20 = vsel %vm733_vm14, %v728_v60, %v730_v5 }
 0x108   : > { %v732_v6 = vpop.permute.xlu1 %731  ;;  %v936_v7 = vpop.permute.xlu0 %935 }
 0x109   : > { %v735_v19 = vsel %vm733_vm14, %v730_v5, %v732_v6 }
 0x10c   : > { %v643_v8 = vpop.permute.xlu0 %642  ;;  %v832_v9 = vpop.permute.xlu1 %831 }
 0x110   : > { %v836_v12 = vpop.permute.xlu0 %835  ;;  %v1027_v13 = vpop.permute.xlu1 %1026 }
 0x114   : > { %v535_v14 = vpop.permute.xlu0 %534  ;;  %v537_v15 = vpop.permute.xlu1 %536 }
 0x115   : > { %v539_v16 = vsel %vm538_vm13, %v533_v3, %v535_v14  ;;  %v540_v17 = vsel %vm538_vm13, %v535_v14, %v537_v15 }
 0x116   : > { %2209 = vmatprep.subr.msk.mxu0 %vm359_vm5, %v540_v17 }
 0x117   : > { %2210 = vmatpush1.msk.msra.mxu0 %vm359_vm5, %v539_v16 }
 0x118   : > { %v1029_v22 = vpop.permute.xlu0 %1028  ;;  %2215 = vmatprep.subr.msk.mxu0 %vm359_vm5, %v735_v19  ;;  %v940_v23 = vpop.permute.xlu1 %939  ;;  %2211 = vmatmul.mubr.msk.f32.vlgmr.msra.gmra.mxu0 %vm355_vm7, %v321_v18 }
 0x119   : > { %2216 = vmatpush1.msk.msra.mxu0 %vm359_vm5, %v734_v20  ;;  %807 = vmatprep.mubr.f32.mxu0 %v2304_v1  ;;  %v1032_v50 = vsel %vm1030_vm2, %v1027_v13, %v1029_v22 }
 0x11c   : > { %v938_v26 = vpop.permute.xlu0 %937  ;;  %v641_v27 = vpop.permute.xlu1 %640  ;;  %2217 = vmatmul.mubr.msk.f32.vlgmr.msra.gmra.mxu0 %vm355_vm7, %v323_v24 }
 0x11d   : > { %v942_v28 = vsel %vm941_vm15, %v936_v7, %v938_v26  ;;  %v943_v32 = vsel %vm941_vm15, %v938_v26, %v940_v23  ;;  %v645_v34 = vsel %vm644_vm0, %v639_v4, %v641_v27  ;;  %v646_v35 = vsel %vm644_vm0, %v641_v27, %v643_v8  ;;  %1015 = vmatprep.mubr.f32.mxu0 %v2304_v1 }
 0x11e   : > { %2212 = vmatprep.subr.msk.mxu1 %vm359_vm5, %v646_v35  ;;  %2221 = vmatprep.subr.msk.mxu0 %vm359_vm5, %v943_v32 }
 0x11f   : > { %2213 = vmatpush1.msk.msra.mxu1 %vm359_vm5, %v645_v34  ;;  %2222 = vmatpush1.msk.msra.mxu0 %vm359_vm5, %v942_v28 }
 0x120   : > { %2214 = vmatmul.mubr.msk.f32.vlgmr.msra.gmra.mxu1 %vm355_vm7, %v322_v37  ;;  %v834_v41 = vpop.permute.xlu1 %833  ;;  %2223 = vmatmul.mubr.msk.f32.vlgmr.msra.gmra.mxu0 %vm355_vm7, %v325_v38  ;;  %v1131_v42 = vpop.permute.xlu0 %1130 }
 0x121   : > { %v838_v43 = vsel %vm837_vm1, %v832_v9, %v834_v41  ;;  %v839_v44 = vsel %vm837_vm1, %v834_v41, %v836_v12  ;;  %911 = vmatprep.mubr.f32.mxu1 %v2304_v1  ;;  %1208 = vmatprep.mubr.f32.mxu0 %v2304_v1 }
 0x122   : > { %2218 = vmatprep.subr.msk.mxu1 %vm359_vm5, %v839_v44 }
 0x123   : > { %2219 = vmatpush1.msk.msra.mxu1 %vm359_vm5, %v838_v43 }
 0x124   : > { %2220 = vmatmul.mubr.msk.f32.vlgmr.msra.gmra.mxu1 %vm355_vm7, %v324_v49  ;;  %2224 = vmatprep.subr.msk.mxu1 %vm359_vm5, %v1032_v50  ;;  %v1025_v53 = vpop.permute.xlu1 %1024  ;;  %v1129_v56 = vpop.permute.xlu0 %1128 }
 0x125   : > { %v1031_v54 = vsel %vm1030_vm2, %v1025_v53, %v1027_v13  ;;  %1104 = vmatprep.mubr.f32.mxu1 %v2304_v1  ;;  %v1135_v60 = vsel %vm1134_vm3, %v1129_v56, %v1131_v42 }
 0x126   : > { %2225 = vmatpush1.msk.msra.mxu1 %vm359_vm5, %v1031_v54 }
 0x128   : > { %2226 = vmatmul.mubr.msk.f32.vlgmr.msra.gmra.mxu1 %vm355_vm7, %v326_v55  ;;  %v1133_v57 = vpop.permute.xlu1 %1132 }
 0x129   : > { %v1136_v58 = vsel %vm1134_vm3, %v1131_v42, %v1133_v57  ;;  %1330 = vmatprep.mubr.f32.mxu1 %v2304_v1 }
 0x12a   : > { %2227 = vmatprep.subr.msk.mxu0 %vm359_vm5, %v1136_v58 }
 0x12b   : > { %2228 = vmatpush1.msk.msra.mxu0 %vm359_vm5, %v1135_v60 }
 0x12c   : > { %2229 = vmatmul.mubr.msk.f32.vlgmr.msra.gmra.mxu0 %vm355_vm7, %v327_v59 }
 0x12d   : > { %1404 = vmatprep.mubr.f32.mxu0 %v2304_v1 }
 0x135   : > { %v1220_v37 = vpop.permute.xlu1 %1219 }
 0x14b   : > { %v510_v63 = vpop.f32.mrf.mxu1 }
 0x14d   : > { %v512_v3 = vpop.f32.mrf.mxu1 }
 0x1bd   : > { %v430_v61 = vpop.f32.mrf.mxu0 }
 0x1be   : > { %v511_v2 = vadd.f32 %v510_v63, %v430_v61 }
 0x1bf   : > { %v432_v62 = vpop.f32.mrf.mxu0 }
 0x1c0   : > { %v513_v6 = vadd.f32 %v512_v3, %v432_v62 }
 0x1d8   : > { %v614_v0 = vpop.f32.mrf.mxu0 }
 0x1d9   : > { %v619_v7 = vadd.f32 %v614_v0, %v511_v2 }
 0x1da   : > { %v616_v4 = vpop.f32.mrf.mxu0 }
 0x1db   : > { %v620_v12 = vadd.f32 %v616_v4, %v513_v6 }
 0x1dc   : > { %v809_v5 = vpop.f32.mrf.mxu0 }
 0x1de   : > { %v811_v8 = vpop.f32.mrf.mxu0 }
 0x1e0   : > { %v720_v9 = vpop.f32.mrf.mxu1  ;;  %v1017_v15 = vpop.f32.mrf.mxu0 }
 0x1e1   : > { %v725_v13 = vadd.f32 %v720_v9, %v619_v7  ;;  %v1227_v7 = vld [vmem:[%s2712_s3 + $0x8] sm:$0xff] }
 0x1e2   : > { %v722_v14 = vpop.f32.mrf.mxu1  ;;  %v1019_v23 = vpop.f32.mrf.mxu0 }
 0x1e3   : > { %v726_v16 = vadd.f32 %v722_v14, %v620_v12  ;;  %v814_v17 = vadd.f32 %v809_v5, %v725_v13 }
 0x1e4   : > { %v913_v18 = vpop.f32.mrf.mxu1 }
 0x1e5   : > { %v815_v19 = vadd.f32 %v811_v8, %v726_v16  ;;  %v918_v20 = vadd.f32 %v913_v18, %v814_v17 }
 0x1e6   : > { %v915_v22 = vpop.f32.mrf.mxu1 }
 0x1e7   : > { %v919_v24 = vadd.f32 %v915_v22, %v815_v19  ;;  %v1022_v26 = vadd.f32 %v1017_v15, %v918_v20  ;;  %v1228_v22 = vld [vmem:[%s2712_s3 + $0x10] sm:$0xff] }
 0x1e8   : > { %v1106_v27 = vpop.f32.mrf.mxu1 }
 0x1e9   : > { %v1023_v28 = vadd.f32 %v1019_v23, %v919_v24  ;;  %v1111_v34 = vadd.f32 %v1106_v27, %v1022_v26 }
 0x1ea   : > { %v1108_v32 = vpop.f32.mrf.mxu1 }
 0x1eb   : > { %v1112_v38 = vadd.f32 %v1108_v32, %v1023_v28 }
 0x1ec   : > { %v1210_v35 = vpop.f32.mrf.mxu0 }
 0x1ed   : > { %v1215_v41 = vadd.f32 %v1210_v35, %v1111_v34  ;;  %v1229_v35 = vld [vmem:[%s2712_s3 + $0x18] sm:$0xff] }
 0x1ee   : > { %v1212_v42 = vpop.f32.mrf.mxu0 }
 0x1ef   : > { %v1216_v43 = vadd.f32 %v1212_v42, %v1112_v38  ;;  %v1222_v44 = vadd.f32 %v1220_v37, %v1215_v41 }
 0x1f1   : > { %v1223_v49 = vadd.f32 %v1220_v37, %v1216_v43  ;;  %v1224_v50 = vmax.f32 %v1222_v44, 0.0  ;;  %v1230_v37 = vld [vmem:[%s2712_s3 + $0x20] sm:$0xff]  ;;  %v1231_v44 = vld [vmem:[%s2712_s3 + $0x28] sm:$0xff] }
 0x1f3   : > { %v1225_v53 = vmax.f32 %v1223_v49, 0.0  ;;  %1238 = vrot.lane.b32.xlu0 %v1224_v50, %s2305_s30 }
 0x1f5   : > { %1240 = vrot.lane.b32.xlu1 %v1225_v53, %s2305_s30 }
 0x265   : > { %v1239_v54 = vpop.permute.xlu0 %1238 }
 0x266   : > { %v1246_v55 = vsel %vm335_vm4, 0.0, %v1239_v54 }
 0x267   : > { %v1241_v56 = vpop.permute.xlu1 %1240  ;;  %1595 = vrot.lane.b32.xlu1 %v1246_v55, %s2312_s14  ;;  %1252 = vrot.lane.b32.xlu0 %v1246_v55, %s2311_s13  ;;  %v1248_v60 = vmul.f32 %v2380_v10, %v1246_v55  ;;  %v1411_v61 = vmul.f32 %v2403_v21, %v1246_v55  ;;  %v1503_v62 = vmul.f32 %v2415_v25, %v1246_v55  ;;  %v1226_v10 = vld [vmem:[%s2712_s3] sm:$0xff] }
 0x268   : > { %v1242_v57 = vsel %vm335_vm4, %v1239_v54, %v1241_v56  ;;  %v1247_v59 = vsel %vm335_vm4, %v1241_v56, 0.0  ;;  %vm1262_vm4 = vcmask 64512   ;;  %v1681_v21 = vmul.f32 %v2425_v30, %v1246_v55  ;;  %v1232_v56 = vld [vmem:[%s2712_s3 + $0x30] sm:$0xff] }
 0x269   : > { %v1249_v58 = vmul.f32 %v2383_v11, %v1242_v57  ;;  %v1773_v11 = vmul.f32 %v2420_v29, %v1246_v55  ;;  %v1412_v25 = vmul.f32 %v1242_v57, %v2453_v39  ;;  %v1413_v29 = vmul.f32 %v2440_v36, %v1247_v59 }
 0x26a   : > { %v1505_v63 = vmul.f32 %v2427_v31, %v1247_v59  ;;  %v1504_v30 = vmul.f32 %v1242_v57, %v2478_v48  ;;  %v1683_v0 = vmul.f32 %v2434_v33, %v1247_v59  ;;  %v1682_v39 = vmul.f32 %v1242_v57, %v2493_v52 }
 0x26b   : > { %1256 = vrot.lane.b32.xlu1 %v1247_v59, %s2311_s13  ;;  %1865 = vrot.lane.b32.xlu0 %v1246_v55, %s2317_s21  ;;  %v1774_v2 = vmul.f32 %v1242_v57, %v2474_v47  ;;  %v1775_v31 = vmul.f32 %v2458_v40, %v1247_v59  ;;  %v1952_v36 = vmul.f32 %v1242_v57, %v2489_v51  ;;  %v2053_v47 = vld [vmem:[%s2715_s6] sm:$0x3f] }
 0x26c   : > { %1370 = vmatprep.subr.mxu0 %v1249_v58  ;;  %v1953_v33 = vmul.f32 %v2468_v45, %v1247_v59  ;;  %v1951_v48 = vmul.f32 %v2470_v46, %v1246_v55  ;;  %v1235_v40 = vld [vmem:[%s2713_s4] sm:$0xff] }
 0x26d   : > { %1371 = vmatpush1.msra.mxu0 %v1248_v60 }
 0x26e   : > { %2231 = vmatmul.mubr.msk.f32.vlgmr.msra.gmra.mxu0 %vm1262_vm4, %v1226_v10 }
 0x26f   : > { %1417 = vrot.lane.b32.xlu1 %v1411_v61, %s2313_s15  ;;  %1254 = vrot.lane.b32.xlu0 %v1242_v57, %s2311_s13 }
 0x270   : > { %1586 = vmatprep.mubr.f32.mxu0 %v2304_v1 }
 0x273   : > { %1597 = vrot.lane.b32.xlu1 %v1242_v57, %s2312_s14  ;;  %1509 = vrot.lane.b32.xlu0 %v1503_v62, %s2314_s16 }
 0x277   : > { %1779 = vrot.lane.b32.xlu1 %v1773_v11, %s2315_s17  ;;  %1599 = vrot.lane.b32.xlu0 %v1247_v59, %s2312_s14  ;;  %v1234_v11 = vld [vmem:[%s2712_s3 + $0x40] sm:$0xff]  ;;  %s2243_s14 = sshll.u32 %s2718_s25, 4 }
 0x27b   : > { %1869 = vrot.lane.b32.xlu1 %v1247_v59, %s2317_s21  ;;  %1687 = vrot.lane.b32.xlu0 %v1681_v21, %s2316_s20 }
 0x27f   : > { %1867 = vrot.lane.b32.xlu0 %v1242_v57, %s2317_s21  ;;  %1419 = vrot.lane.b32.xlu1 %v1412_v25, %s2313_s15  ;;  %v1233_v57 = vld [vmem:[%s2712_s3 + $0x38] sm:$0xff] }
 0x283   : > { %1421 = vrot.lane.b32.xlu0 %v1413_v29, %s2313_s15  ;;  %1513 = vrot.lane.b32.xlu1 %v1505_v63, %s2314_s16 }
 0x287   : > { %1511 = vrot.lane.b32.xlu0 %v1504_v30, %s2314_s16  ;;  %1691 = vrot.lane.b32.xlu1 %v1683_v0, %s2316_s20 }
 0x28b   : > { %1689 = vrot.lane.b32.xlu0 %v1682_v39, %s2316_s20  ;;  %1781 = vrot.lane.b32.xlu1 %v1774_v2, %s2315_s17 }
 0x28f   : > { %1783 = vrot.lane.b32.xlu0 %v1775_v31, %s2315_s17  ;;  %1959 = vrot.lane.b32.xlu1 %v1952_v36, %s2319_s22  ;;  %s278_s17 = scalar_lea.vmem %s2716_s7, %s2243_s14 }
 0x293   : > { %1961 = vrot.lane.b32.xlu0 %v1953_v33, %s2319_s22  ;;  %1957 = vrot.lane.b32.xlu1 %v1951_v48, %s2319_s22 }
 0x297   : > { %2056 = vperm.xlu1 %2293, %v2053_v47   ;;  %2045 = vperm.xlu0 %2294, %v1235_v40  }
 0x2d9   : > { %v1596_v51 = vpop.permute.xlu1 %1595  ;;  %v1253_v52 = vpop.permute.xlu0 %1252 }
 0x2dd   : > { %v1257_v3 = vpop.permute.xlu1 %1256  ;;  %v1866_v45 = vpop.permute.xlu0 %1865 }
 0x2e1   : > { %v1418_v4 = vpop.permute.xlu1 %1417  ;;  %v1255_v46 = vpop.permute.xlu0 %1254 }
 0x2e2   : > { %v1258_v5 = vsel %vm352_vm12, %v1253_v52, %v1255_v46  ;;  %v1259_v6 = vsel %vm352_vm12, %v1255_v46, %v1257_v3 }
 0x2e3   : > { %1296 = vmatprep.subr.mxu1 %v1259_v6 }
 0x2e4   : > { %1297 = vmatpush1.msra.mxu1 %v1258_v5 }
 0x2e5   : > { %v1598_v8 = vpop.permute.xlu1 %1597  ;;  %v1510_v9 = vpop.permute.xlu0 %1509  ;;  %2230 = vmatmul.mubr.msk.f32.vlgmr.msra.gmra.mxu1 %vm1262_vm4, %v1227_v7 }
 0x2e6   : > { %1494 = vmatprep.mubr.f32.mxu1 %v2304_v1  ;;  %v1601_v26 = vsel %vm733_vm14, %v1596_v51, %v1598_v8 }
 0x2e9   : > { %v1780_v12 = vpop.permute.xlu1 %1779  ;;  %v1600_v13 = vpop.permute.xlu0 %1599 }
 0x2ea   : > { %v1602_v24 = vsel %vm733_vm14, %v1598_v8, %v1600_v13 }
 0x2ed   : > { %v1870_v14 = vpop.permute.xlu1 %1869  ;;  %v1688_v15 = vpop.permute.xlu0 %1687 }
 0x2f1   : > { %v1868_v16 = vpop.permute.xlu0 %1867  ;;  %v1420_v17 = vpop.permute.xlu1 %1419 }
 0x2f2   : > { %v1423_v23 = vsel %vm538_vm13, %v1418_v4, %v1420_v17  ;;  %v1872_v49 = vsel %vm1030_vm2, %v1868_v16, %v1870_v14  ;;  %v1871_v50 = vsel %vm1030_vm2, %v1866_v45, %v1868_v16 }
 0x2f5   : > { %v1422_v18 = vpop.permute.xlu0 %1421  ;;  %v1514_v19 = vpop.permute.xlu1 %1513 }
 0x2f6   : > { %v1424_v20 = vsel %vm538_vm13, %v1420_v17, %v1422_v18 }
 0x2f7   : > { %1460 = vmatprep.subr.mxu1 %v1424_v20 }
 0x2f8   : > { %1461 = vmatpush1.msra.mxu1 %v1423_v23 }
 0x2f9   : > { %v1512_v27 = vpop.permute.xlu0 %1511  ;;  %2232 = vmatmul.mubr.msk.f32.vlgmr.msra.gmra.mxu1 %vm1262_vm4, %v1228_v22  ;;  %1638 = vmatprep.subr.mxu1 %v1602_v24  ;;  %v1692_v28 = vpop.permute.xlu1 %1691 }
 0x2fa   : > { %v1515_v32 = vsel %vm644_vm0, %v1510_v9, %v1512_v27  ;;  %1639 = vmatpush1.msra.mxu1 %v1601_v26  ;;  %v1516_v34 = vsel %vm644_vm0, %v1512_v27, %v1514_v19  ;;  %1672 = vmatprep.mubr.f32.mxu1 %v2304_v1  ;;  %v2052_v26 = vld [vmem:[%s2714_s5] sm:$0x3f] }
 0x2fb   : > { %1552 = vmatprep.subr.mxu0 %v1516_v34 }
 0x2fc   : > { %1553 = vmatpush1.msra.mxu0 %v1515_v32 }
 0x2fd   : > { %v1690_v38 = vpop.permute.xlu0 %1689  ;;  %v1782_v41 = vpop.permute.xlu1 %1781  ;;  %2233 = vmatmul.mubr.msk.f32.vlgmr.msra.gmra.mxu0 %vm1262_vm4, %v1229_v35  ;;  %2234 = vmatmul.mubr.msk.f32.vlgmr.msra.gmra.mxu1 %vm1262_vm4, %v1230_v37 }
 0x2fe   : > { %v1693_v42 = vsel %vm837_vm1, %v1688_v15, %v1690_v38  ;;  %v1694_v43 = vsel %vm837_vm1, %v1690_v38, %v1692_v28  ;;  %1764 = vmatprep.mubr.f32.mxu0 %v2304_v1  ;;  %1856 = vmatprep.mubr.f32.mxu1 %v2304_v1  ;;  %v1785_v58 = vsel %vm941_vm15, %v1780_v12, %v1782_v41 }
 0x2ff   : > { %1730 = vmatprep.subr.mxu0 %v1694_v43 }
 0x300   : > { %1731 = vmatpush1.msra.mxu0 %v1693_v42 }
 0x301   : > { %v1784_v53 = vpop.permute.xlu0 %1783  ;;  %v1960_v54 = vpop.permute.xlu1 %1959  ;;  %2235 = vmatmul.mubr.msk.f32.vlgmr.msra.gmra.mxu0 %vm1262_vm4, %v1231_v44  ;;  %1908 = vmatprep.subr.mxu0 %v1872_v49 }
 0x302   : > { %1909 = vmatpush1.msra.mxu0 %v1871_v50  ;;  %v1786_v55 = vsel %vm941_vm15, %v1782_v41, %v1784_v53  ;;  %1942 = vmatprep.mubr.f32.mxu0 %v2304_v1 }
 0x303   : > { %1822 = vmatprep.subr.mxu1 %v1786_v55 }
 0x304   : > { %1823 = vmatpush1.msra.mxu1 %v1785_v58 }
 0x305   : > { %v1962_v59 = vpop.permute.xlu0 %1961  ;;  %2236 = vmatmul.mubr.msk.f32.vlgmr.msra.gmra.mxu1 %vm1262_vm4, %v1232_v56  ;;  %v1958_v60 = vpop.permute.xlu1 %1957  ;;  %2237 = vmatmul.mubr.msk.f32.vlgmr.msra.gmra.mxu0 %vm1262_vm4, %v1233_v57 }
 0x306   : > { %v1963_v61 = vsel %vm1134_vm3, %v1958_v60, %v1960_v54  ;;  %v1964_v62 = vsel %vm1134_vm3, %v1960_v54, %v1962_v59  ;;  %2034 = vmatprep.mubr.f32.mxu1 %v2304_v1  ;;  %2126 = vmatprep.mubr.f32.mxu0 %v2304_v1 }
 0x307   : > { %2000 = vmatprep.subr.mxu1 %v1964_v62 }
 0x308   : > { %2001 = vmatpush1.msra.mxu1 %v1963_v61 }
 0x309   : > { %2238 = vmatmul.mubr.msk.f32.vlgmr.msra.gmra.mxu1 %vm1262_vm4, %v1234_v11 }
 0x312   : > { %v2046_v17 = vpop.permute.xlu0 %2045  ;;  %v2057_v27 = vpop.permute.xlu1 %2056 }
 0x32e   : > { %v1406_v21 = vpop.f32.mrf.mxu0 }
 0x330   : > { %v1408_v63 = vpop.f32.mrf.mxu0 }
 0x3a5   : > { %v1332_v10 = vpop.f32.mrf.mxu1 }
 0x3a6   : > { %v1407_v29 = vadd.f32 %v1406_v21, %v1332_v10 }
 0x3a7   : > { %v1334_v25 = vpop.f32.mrf.mxu1 }
 0x3a8   : > { %v1409_v0 = vadd.f32 %v1408_v63, %v1334_v25 }
 0x3b9   : > { %v1496_v30 = vpop.f32.mrf.mxu1 }
 0x3ba   : > { %v1501_v39 = vadd.f32 %v1496_v30, %v1407_v29 }
 0x3bb   : > { %v1498_v2 = vpop.f32.mrf.mxu1 }
 0x3bc   : > { %v1502_v33 = vadd.f32 %v1498_v2, %v1409_v0 }
 0x3bd   : > { %v1588_v31 = vpop.f32.mrf.mxu0  ;;  %v1674_v36 = vpop.f32.mrf.mxu1 }
 0x3be   : > { %v1593_v48 = vadd.f32 %v1588_v31, %v1501_v39 }
 0x3bf   : > { %v1590_v47 = vpop.f32.mrf.mxu0  ;;  %v1676_v40 = vpop.f32.mrf.mxu1 }
 0x3c0   : > { %v1594_v1 = vadd.f32 %v1590_v47, %v1502_v33  ;;  %v1679_v51 = vadd.f32 %v1674_v36, %v1593_v48 }
 0x3c1   : > { %v1766_v52 = vpop.f32.mrf.mxu0 }
 0x3c2   : > { %v1680_v3 = vadd.f32 %v1676_v40, %v1594_v1  ;;  %v1771_v4 = vadd.f32 %v1766_v52, %v1679_v51 }
 0x3c3   : > { %v1768_v45 = vpop.f32.mrf.mxu0 }
 0x3c4   : > { %v1772_v6 = vadd.f32 %v1768_v45, %v1680_v3 }
 0x3c5   : > { %v1858_v46 = vpop.f32.mrf.mxu1  ;;  %v1944_v5 = vpop.f32.mrf.mxu0 }
 0x3c6   : > { %v1863_v7 = vadd.f32 %v1858_v46, %v1771_v4 }
 0x3c7   : > { %v1860_v8 = vpop.f32.mrf.mxu1  ;;  %v1946_v13 = vpop.f32.mrf.mxu0 }
 0x3c8   : > { %v1949_v9 = vadd.f32 %v1944_v5, %v1863_v7  ;;  %v1864_v12 = vadd.f32 %v1860_v8, %v1772_v6 }
 0x3c9   : > { %v2036_v14 = vpop.f32.mrf.mxu1 }
 0x3ca   : > { %v1950_v15 = vadd.f32 %v1946_v13, %v1864_v12  ;;  %v2041_v16 = vadd.f32 %v2036_v14, %v1949_v9 }
 0x3cb   : > { %v2038_v18 = vpop.f32.mrf.mxu1 }
 0x3cc   : > { %v2042_v19 = vadd.f32 %v2038_v18, %v1950_v15  ;;  %v2048_v20 = vadd.f32 %v2046_v17, %v2041_v16 }
 0x3ce   : > { %v2049_v22 = vadd.f32 %v2046_v17, %v2042_v19  ;;  %v2050_v24 = vmax.f32 %v2048_v20, 0.0 }
 0x3d0   : > { %v2051_v23 = vmax.f32 %v2049_v22, 0.0 }
 0x3d2   : > { %2092 = vmatprep.subr.mxu0 %v2051_v23 }
 0x3d3   : > { %2093 = vmatpush1.msra.mxu0 %v2050_v24 }
 0x3d4   : > { %2239 = vmatmul.mubr.msk.f32.vlgmr.msra.gmra.mxu0 %vm1262_vm4, %v2052_v26 }
 0x494   : > { %v2128_v28 = vpop.f32.mrf.mxu0 }
 0x495   : > { %v2129_v32 = vadd.f32 %v2128_v28, %v2057_v27 }
 0x496   : > { %v2130_v34 = vpop.f32.mrf.mxu0 }
 0x497   : > { %2133 = vst [vmem:[%s278_s17] sm:$0x3f] %v2129_v32  ;;  %v2131_v35 = vadd.f32 %v2130_v34, %v2057_v27 }
 0x499   : > { %2134 = vst [vmem:[%s278_s17 + $0x8] sm:$0x3f] %v2131_v35 }
 0x49a PF: > { %s17_s24 = sadd.s32 1, %s2302_s24  }
 0x49b   : > { %p14_p4 = scmp.ge.s32.totalorder %s17_s24, 4  }
 0x49d   :  { %16 = sbr.rel (!%p14_p4) target bundleno = 1 (0x1), region = 78 }

</bundles_post_ra>
